<compile_context>
chip_gen: v7x
topology: tpu7x:2x2x1
jax: 0.10.0
libtpu: 0.0.40
codegen_flags: <defaults>
</compile_context>

<pallas_src>
import jax
import jax.numpy as jnp
from jax.experimental import pallas as pl
from jax.experimental.pallas import tpu as pltpu


def _uncertainty_kernel(x_ref, w1_ref, b1_ref, w2_ref, b2_ref, wmv_ref, bmv_ref,
                        out_ref):
    # x_ref: (TM, D_in) f32; w*: bf16 (D_in, D_in) / (D_in, 2*D_out);
    # b*: f32 (1, D); out_ref: (TM, 2*D_out) f32 with interleaved [m0,v0,m1,v1,...].
    x = x_ref[...].astype(w1_ref.dtype)                       # f32 -> bf16 in-kernel

    h = jnp.dot(x, w1_ref[...], preferred_element_type=jnp.float32) + b1_ref[...]
    h = jnp.maximum(h, 0.0).astype(w2_ref.dtype)

    h = jnp.dot(h, w2_ref[...], preferred_element_type=jnp.float32) + b2_ref[...]
    h = jnp.maximum(h, 0.0).astype(wmv_ref.dtype)

    out = jnp.dot(h, wmv_ref[...], preferred_element_type=jnp.float32) + bmv_ref[...]
    out_ref[...] = out.astype(out_ref.dtype)


def _vmem_budget():
    """(vmem_limit_bytes, row-tile budget) derived from the chip's VMEM capacity."""
    cap = None
    try:
        info = pltpu.get_tpu_info()
        cap = getattr(info, "vmem_capacity_bytes", None) or getattr(info, "vmem_bytes", None)
    except Exception:
        cap = None
    if not cap:
        cap = 64 << 20                      # conservative: assume v7x-sized VMEM
    cap = int(cap)
    limit = min(cap - (16 << 20), 100 << 20)   # headroom for Mosaic scratch
    limit = max(limit, 32 << 20)
    tile_budget = max(limit - (8 << 20), 24 << 20)
    return limit, tile_budget


def _round16(n):
    return max(16, (n // 16) * 16)


def _pick_row_tile(rows, d_in, d_out2, requested, budget_bytes):
    """Largest multiple of 16 <= requested fitting the VMEM budget (>=4 grid steps when possible)."""
    rt = min(requested, ((rows + 15) // 16) * 16)
    rt = _round16(rt)
    # Resident (single-buffered) bf16 weights + f32 biases.
    fixed = (2 * d_in * d_in + d_in * d_out2) * 2 + (2 * d_in + d_out2) * 4
    # Per-row: double-buffered f32 x block + double-buffered f32 out block
    # + live intermediates (x bf16, h f32, h bf16, out f32), with ~20% margin.
    per_row = 2 * d_in * 4 + 2 * d_out2 * 4 + (d_in * 2 + d_in * 4 + d_in * 2 + d_out2 * 4)
    per_row = max(int(per_row * 1.2), 1)
    avail = max(budget_bytes - fixed, 16 * per_row)
    rt = min(rt, _round16(avail // per_row))
    # Keep >= 4 grid steps when rows allow (megacore sharding on v7x; cheap elsewhere).
    if rows >= 4 * 16:
        rt = min(rt, _round16((rows + 3) // 4))
    return rt


def uncertainty_head_forward(x, params, *, row_tile=None, matmul_dtype=jnp.bfloat16):
    """x: (B, S, D_in) float32 -> (B, S, D_out, 2) float32."""
    B, S, D_in = x.shape
    w1, b1, w2, b2, wm, bm, wv, bv = params
    D_out = wm.shape[1]
    D_out2 = 2 * D_out

    # Interleave mean/logvar columns ([m0,v0,m1,v1,...]) so the kernel output
    # reshapes straight to (B, S, D_out, 2) -- no trailing transpose.
    wmv = jnp.stack([wm, wv], axis=2).reshape(D_in, D_out2)
    bmv = jnp.stack([bm, bv], axis=2).reshape(1, D_out2)

    rows = B * S
    vmem_limit, tile_budget = _vmem_budget()
    if row_tile is None:
        row_tile = 1024 if tile_budget >= (80 << 20) else 512
    rt = _pick_row_tile(rows, D_in, D_out2, row_tile, tile_budget)
    grid = (pl.cdiv(rows, rt),)

    x2d = x.reshape(rows, D_in)                      # stays f32; cast happens in-kernel

    w1c = w1.astype(matmul_dtype)
    w2c = w2.astype(matmul_dtype)
    wmvc = wmv.astype(matmul_dtype)
    b1f = b1.astype(jnp.float32)
    b2f = b2.astype(jnp.float32)
    bmvf = bmv.astype(jnp.float32)

    flops = 2 * rows * (2 * D_in * D_in + D_in * D_out2)
    bytes_accessed = (
        rows * D_in * 4                            # x (f32)
        + rows * D_out2 * 4                        # fused output (f32)
        + (w1c.size + w2c.size + wmvc.size) * 2    # bf16 weights
        + (b1f.size + b2f.size + bmvf.size) * 4    # f32 biases
    )

    def build(single_buffer_weights):
        if single_buffer_weights:
            full = lambda shp: pl.BlockSpec(shp, lambda i: (0, 0),
                                            pipeline_mode=pl.Buffered(1))
        else:
            full = lambda shp: pl.BlockSpec(shp, lambda i: (0, 0))
        return pl.pallas_call(
            _uncertainty_kernel,
            out_shape=jax.ShapeDtypeStruct((rows, D_out2), jnp.float32),
            grid_spec=pltpu.PrefetchScalarGridSpec(
                num_scalar_prefetch=0,
                grid=grid,
                in_specs=[
                    pl.BlockSpec((rt, D_in), lambda i: (i, 0)),
                    full(w1c.shape), full(b1f.shape),
                    full(w2c.shape), full(b2f.shape),
                    full(wmvc.shape), full(bmvf.shape),
                ],
                out_specs=pl.BlockSpec((rt, D_out2), lambda i: (i, 0)),
            ),
            compiler_params=pltpu.CompilerParams(
                dimension_semantics=("parallel",),
                vmem_limit_bytes=vmem_limit,
            ),
            cost_estimate=pl.CostEstimate(
                flops=flops, transcendentals=0, bytes_accessed=bytes_accessed),
        )

    args = (x2d, w1c, b1f, w2c, b2f, wmvc, bmvf)
    try:
        out2d = jax.block_until_ready(build(True)(*args))
    except Exception:
        # Fallback if this JAX build rejects Buffered(1) for resident blocks.
        out2d = build(False)(*args)

    # Interleaved [m0,v0,m1,v1,...] columns -> (B, S, D_out, 2) == torch.stack(..., dim=3)
    return out2d.reshape(B, S, D_out, 2)


def init_params(key, input_dim, output_dim):
    """Deterministic synthetic init (PyTorch-Linear-like uniform), weights stored (in, out)."""
    ks = jax.random.split(key, 8)

    def lin(kw, kb, fan_in, fan_out):
        bound = 1.0 / jnp.sqrt(fan_in)
        w = jax.random.uniform(kw, (fan_in, fan_out), jnp.float32, -bound, bound)
        b = jax.random.uniform(kb, (1, fan_out), jnp.float32, -bound, bound)
        return w, b

    w1, b1 = lin(ks[0], ks[1], input_dim, input_dim)
    w2, b2 = lin(ks[2], ks[3], input_dim, input_dim)
    wm, bm = lin(ks[4], ks[5], input_dim, output_dim)
    wv, bv = lin(ks[6], ks[7], input_dim, output_dim)
    return (w1, b1, w2, b2, wm, bm, wv, bv)


def _reference(x, params):
    w1, b1, w2, b2, wm, bm, wv, bv = params
    h = jnp.maximum(x @ w1 + b1[0], 0.0)
    h = jnp.maximum(h @ w2 + b2[0], 0.0)
    mean = h @ wm + bm[0]
    logvar = h @ wv + bv[0]
    return jnp.stack((mean, logvar), axis=3)


if __name__ == "__main__":
    # NOTE: Dropout layers are identity in inference mode (eval()); no RNG needed.
    B, S, input_dim, output_dim = 2, 8, 32, 4
    key = jax.random.PRNGKey(0)
    kx, kp = jax.random.split(key)
    x = jax.random.normal(kx, (B, S, input_dim), jnp.float32)
    params = init_params(kp, input_dim, output_dim)

    out = uncertainty_head_forward(x, params)
    out = jax.block_until_ready(out)

    ref = _reference(x, params)
    assert out.shape == (B, S, output_dim, 2), out.shape
    # bf16 matmul operands with f32 accumulation -> bf16-level tolerance vs f32 ref.
    assert jnp.allclose(out, ref, atol=3e-2, rtol=3e-2), (
        "mismatch vs reference; max abs diff = %f" % float(jnp.max(jnp.abs(out - ref))))
    print("KERNEL_OK")
</pallas_src>

<mosaic_0001>
module attributes {stable_mosaic.version = 11 : i64} {
  func.func @_uncertainty_kernel(%arg0: i32, %arg1: memref<16x32xf32, #tpu.memory_space<vmem>>, %arg2: memref<32x32xbf16, #tpu.memory_space<vmem>>, %arg3: memref<1x32xf32, #tpu.memory_space<vmem>>, %arg4: memref<32x32xbf16, #tpu.memory_space<vmem>>, %arg5: memref<1x32xf32, #tpu.memory_space<vmem>>, %arg6: memref<32x8xbf16, #tpu.memory_space<vmem>>, %arg7: memref<1x8xf32, #tpu.memory_space<vmem>>, %arg8: memref<16x8xf32, #tpu.memory_space<vmem>>) attributes {dimension_semantics = [#tpu.dimension_semantics<parallel>], iteration_bounds = array<i64: 1>, scalar_prefetch = 0 : i64, scratch_operands = 0 : i64, tpu.core_type = #tpu.core_type<tc>, window_params = [{transform_indices = @transform_0, window_bounds = array<i64: 16, 32>}, {pipeline_mode = #tpu.pipeline_mode<synchronous>, transform_indices = @transform_1, window_bounds = array<i64: 32, 32>}, {pipeline_mode = #tpu.pipeline_mode<synchronous>, transform_indices = @transform_2, window_bounds = array<i64: 1, 32>}, {pipeline_mode = #tpu.pipeline_mode<synchronous>, transform_indices = @transform_3, window_bounds = array<i64: 32, 32>}, {pipeline_mode = #tpu.pipeline_mode<synchronous>, transform_indices = @transform_4, window_bounds = array<i64: 1, 32>}, {pipeline_mode = #tpu.pipeline_mode<synchronous>, transform_indices = @transform_5, window_bounds = array<i64: 32, 8>}, {pipeline_mode = #tpu.pipeline_mode<synchronous>, transform_indices = @transform_6, window_bounds = array<i64: 1, 8>}, {transform_indices = @transform_7, window_bounds = array<i64: 16, 8>}]} {
    %c0 = arith.constant 0 : index
    %c0_0 = arith.constant 0 : index
    %0 = vector.load %arg1[%c0, %c0_0] : memref<16x32xf32, #tpu.memory_space<vmem>>, vector<16x32xf32>
    %1 = arith.truncf %0 : vector<16x32xf32> to vector<16x32xbf16>
    %c0_1 = arith.constant 0 : index
    %c0_2 = arith.constant 0 : index
    %2 = vector.load %arg2[%c0_1, %c0_2] : memref<32x32xbf16, #tpu.memory_space<vmem>>, vector<32x32xbf16>
    %cst = arith.constant dense<0.000000e+00> : vector<16x32xf32>
    %3 = tpu.matmul %1, %2, %cst {dimension_numbers = #tpu.dot_dimension_numbers<[1], [0], [0], [1], [0, 0, 1, 1], [], []>} : vector<16x32xbf16>, vector<32x32xbf16>, vector<16x32xf32> -> vector<16x32xf32>
    %c0_3 = arith.constant 0 : index
    %c0_4 = arith.constant 0 : index
    %4 = vector.load %arg3[%c0_3, %c0_4] : memref<1x32xf32, #tpu.memory_space<vmem>>, vector<1x32xf32>
    %5 = vector.broadcast %4 : vector<1x32xf32> to vector<16x32xf32>
    %6 = arith.addf %3, %5 : vector<16x32xf32>
    %cst_5 = arith.constant 0.000000e+00 : f32
    %7 = vector.broadcast %cst_5 : f32 to vector<16x32xf32>
    %8 = arith.maximumf %6, %7 : vector<16x32xf32>
    %9 = arith.truncf %8 : vector<16x32xf32> to vector<16x32xbf16>
    %c0_6 = arith.constant 0 : index
    %c0_7 = arith.constant 0 : index
    %10 = vector.load %arg4[%c0_6, %c0_7] : memref<32x32xbf16, #tpu.memory_space<vmem>>, vector<32x32xbf16>
    %cst_8 = arith.constant dense<0.000000e+00> : vector<16x32xf32>
    %11 = tpu.matmul %9, %10, %cst_8 {dimension_numbers = #tpu.dot_dimension_numbers<[1], [0], [0], [1], [0, 0, 1, 1], [], []>} : vector<16x32xbf16>, vector<32x32xbf16>, vector<16x32xf32> -> vector<16x32xf32>
    %c0_9 = arith.constant 0 : index
    %c0_10 = arith.constant 0 : index
    %12 = vector.load %arg5[%c0_9, %c0_10] : memref<1x32xf32, #tpu.memory_space<vmem>>, vector<1x32xf32>
    %13 = vector.broadcast %12 : vector<1x32xf32> to vector<16x32xf32>
    %14 = arith.addf %11, %13 : vector<16x32xf32>
    %cst_11 = arith.constant 0.000000e+00 : f32
    %15 = vector.broadcast %cst_11 : f32 to vector<16x32xf32>
    %16 = arith.maximumf %14, %15 : vector<16x32xf32>
    %17 = arith.truncf %16 : vector<16x32xf32> to vector<16x32xbf16>
    %c0_12 = arith.constant 0 : index
    %c0_13 = arith.constant 0 : index
    %18 = vector.load %arg6[%c0_12, %c0_13] : memref<32x8xbf16, #tpu.memory_space<vmem>>, vector<32x8xbf16>
    %cst_14 = arith.constant dense<0.000000e+00> : vector<16x8xf32>
    %19 = tpu.matmul %17, %18, %cst_14 {dimension_numbers = #tpu.dot_dimension_numbers<[1], [0], [0], [1], [0, 0, 1, 1], [], []>} : vector<16x32xbf16>, vector<32x8xbf16>, vector<16x8xf32> -> vector<16x8xf32>
    %c0_15 = arith.constant 0 : index
    %c0_16 = arith.constant 0 : index
    %20 = vector.load %arg7[%c0_15, %c0_16] : memref<1x8xf32, #tpu.memory_space<vmem>>, vector<1x8xf32>
    %21 = vector.broadcast %20 : vector<1x8xf32> to vector<16x8xf32>
    %22 = arith.addf %19, %21 : vector<16x8xf32>
    %c0_17 = arith.constant 0 : index
    %c0_18 = arith.constant 0 : index
    %23 = vector.load %arg8[%c0_17, %c0_18] : memref<16x8xf32, #tpu.memory_space<vmem>>, vector<16x8xf32>
    tpu.vector_store %arg8[%c0_17, %c0_18], %22 {strides = array<i32>} : memref<16x8xf32, #tpu.memory_space<vmem>>, vector<16x8xf32>,
    return
  }
  func.func @transform_0(%arg0: i32) -> (i32, i32) {
    %c0_i32 = arith.constant 0 : i32
    %c0_i32_0 = arith.constant 0 : i32
    return %arg0, %c0_i32 : i32, i32
  }
  func.func @transform_1(%arg0: i32) -> (i32, i32) {
    %c0_i32 = arith.constant 0 : i32
    %c0_i32_0 = arith.constant 0 : i32
    %c0_i32_1 = arith.constant 0 : i32
    return %c0_i32, %c0_i32_0 : i32, i32
  }
  func.func @transform_2(%arg0: i32) -> (i32, i32) {
    %c0_i32 = arith.constant 0 : i32
    %c0_i32_0 = arith.constant 0 : i32
    %c0_i32_1 = arith.constant 0 : i32
    return %c0_i32, %c0_i32_0 : i32, i32
  }
  func.func @transform_3(%arg0: i32) -> (i32, i32) {
    %c0_i32 = arith.constant 0 : i32
    %c0_i32_0 = arith.constant 0 : i32
    %c0_i32_1 = arith.constant 0 : i32
    return %c0_i32, %c0_i32_0 : i32, i32
  }
  func.func @transform_4(%arg0: i32) -> (i32, i32) {
    %c0_i32 = arith.constant 0 : i32
    %c0_i32_0 = arith.constant 0 : i32
    %c0_i32_1 = arith.constant 0 : i32
    return %c0_i32, %c0_i32_0 : i32, i32
  }
  func.func @transform_5(%arg0: i32) -> (i32, i32) {
    %c0_i32 = arith.constant 0 : i32
    %c0_i32_0 = arith.constant 0 : i32
    %c0_i32_1 = arith.constant 0 : i32
    return %c0_i32, %c0_i32_0 : i32, i32
  }
  func.func @transform_6(%arg0: i32) -> (i32, i32) {
    %c0_i32 = arith.constant 0 : i32
    %c0_i32_0 = arith.constant 0 : i32
    %c0_i32_1 = arith.constant 0 : i32
    return %c0_i32, %c0_i32_0 : i32, i32
  }
  func.func @transform_7(%arg0: i32) -> (i32, i32) {
    %c0_i32 = arith.constant 0 : i32
    %c0_i32_0 = arith.constant 0 : i32
    return %arg0, %c0_i32 : i32, i32
  }
}

module attributes {stable_mosaic.version = 11 : i64} {
  func.func @_uncertainty_kernel(%arg0: i32, %arg1: memref<16x32xf32, #tpu.memory_space<vmem>>, %arg2: memref<32x32xbf16, #tpu.memory_space<vmem>>, %arg3: memref<1x32xf32, #tpu.memory_space<vmem>>, %arg4: memref<32x32xbf16, #tpu.memory_space<vmem>>, %arg5: memref<1x32xf32, #tpu.memory_space<vmem>>, %arg6: memref<32x8xbf16, #tpu.memory_space<vmem>>, %arg7: memref<1x8xf32, #tpu.memory_space<vmem>>, %arg8: memref<16x8xf32, #tpu.memory_space<vmem>>) attributes {dimension_semantics = [#tpu.dimension_semantics<parallel>], iteration_bounds = array<i64: 1>, scalar_prefetch = 0 : i64, scratch_operands = 0 : i64, tpu.core_type = #tpu.core_type<tc>, window_params = [{transform_indices = @transform_0, window_bounds = array<i64: 16, 32>}, {pipeline_mode = #tpu.pipeline_mode<synchronous>, transform_indices = @transform_1, window_bounds = array<i64: 32, 32>}, {pipeline_mode = #tpu.pipeline_mode<synchronous>, transform_indices = @transform_2, window_bounds = array<i64: 1, 32>}, {pipeline_mode = #tpu.pipeline_mode<synchronous>, transform_indices = @transform_3, window_bounds = array<i64: 32, 32>}, {pipeline_mode = #tpu.pipeline_mode<synchronous>, transform_indices = @transform_4, window_bounds = array<i64: 1, 32>}, {pipeline_mode = #tpu.pipeline_mode<synchronous>, transform_indices = @transform_5, window_bounds = array<i64: 32, 8>}, {pipeline_mode = #tpu.pipeline_mode<synchronous>, transform_indices = @transform_6, window_bounds = array<i64: 1, 8>}, {transform_indices = @transform_7, window_bounds = array<i64: 16, 8>}]} {
    %c0 = arith.constant 0 : index
    %c0_0 = arith.constant 0 : index
    %0 = vector.load %arg1[%c0, %c0_0] : memref<16x32xf32, #tpu.memory_space<vmem>>, vector<16x32xf32>
    %1 = arith.truncf %0 : vector<16x32xf32> to vector<16x32xbf16>
    %c0_1 = arith.constant 0 : index
    %c0_2 = arith.constant 0 : index
    %2 = vector.load %arg2[%c0_1, %c0_2] : memref<32x32xbf16, #tpu.memory_space<vmem>>, vector<32x32xbf16>
    %cst = arith.constant dense<0.000000e+00> : vector<16x32xf32>
    %3 = tpu.matmul %1, %2, %cst {dimension_numbers = #tpu.dot_dimension_numbers<[1], [0], [0], [1], [0, 0, 1, 1], [], []>} : vector<16x32xbf16>, vector<32x32xbf16>, vector<16x32xf32> -> vector<16x32xf32>
    %c0_3 = arith.constant 0 : index
    %c0_4 = arith.constant 0 : index
    %4 = vector.load %arg3[%c0_3, %c0_4] : memref<1x32xf32, #tpu.memory_space<vmem>>, vector<1x32xf32>
    %5 = vector.broadcast %4 : vector<1x32xf32> to vector<16x32xf32>
    %6 = arith.addf %3, %5 : vector<16x32xf32>
    %cst_5 = arith.constant 0.000000e+00 : f32
    %7 = vector.broadcast %cst_5 : f32 to vector<16x32xf32>
    %8 = arith.maximumf %6, %7 : vector<16x32xf32>
    %9 = arith.truncf %8 : vector<16x32xf32> to vector<16x32xbf16>
    %c0_6 = arith.constant 0 : index
    %c0_7 = arith.constant 0 : index
    %10 = vector.load %arg4[%c0_6, %c0_7] : memref<32x32xbf16, #tpu.memory_space<vmem>>, vector<32x32xbf16>
    %cst_8 = arith.constant dense<0.000000e+00> : vector<16x32xf32>
    %11 = tpu.matmul %9, %10, %cst_8 {dimension_numbers = #tpu.dot_dimension_numbers<[1], [0], [0], [1], [0, 0, 1, 1], [], []>} : vector<16x32xbf16>, vector<32x32xbf16>, vector<16x32xf32> -> vector<16x32xf32>
    %c0_9 = arith.constant 0 : index
    %c0_10 = arith.constant 0 : index
    %12 = vector.load %arg5[%c0_9, %c0_10] : memref<1x32xf32, #tpu.memory_space<vmem>>, vector<1x32xf32>
    %13 = vector.broadcast %12 : vector<1x32xf32> to vector<16x32xf32>
    %14 = arith.addf %11, %13 : vector<16x32xf32>
    %cst_11 = arith.constant 0.000000e+00 : f32
    %15 = vector.broadcast %cst_11 : f32 to vector<16x32xf32>
    %16 = arith.maximumf %14, %15 : vector<16x32xf32>
    %17 = arith.truncf %16 : vector<16x32xf32> to vector<16x32xbf16>
    %c0_12 = arith.constant 0 : index
    %c0_13 = arith.constant 0 : index
    %18 = vector.load %arg6[%c0_12, %c0_13] : memref<32x8xbf16, #tpu.memory_space<vmem>>, vector<32x8xbf16>
    %cst_14 = arith.constant dense<0.000000e+00> : vector<16x8xf32>
    %19 = tpu.matmul %17, %18, %cst_14 {dimension_numbers = #tpu.dot_dimension_numbers<[1], [0], [0], [1], [0, 0, 1, 1], [], []>} : vector<16x32xbf16>, vector<32x8xbf16>, vector<16x8xf32> -> vector<16x8xf32>
    %c0_15 = arith.constant 0 : index
    %c0_16 = arith.constant 0 : index
    %20 = vector.load %arg7[%c0_15, %c0_16] : memref<1x8xf32, #tpu.memory_space<vmem>>, vector<1x8xf32>
    %21 = vector.broadcast %20 : vector<1x8xf32> to vector<16x8xf32>
    %22 = arith.addf %19, %21 : vector<16x8xf32>
    %c0_17 = arith.constant 0 : index
    %c0_18 = arith.constant 0 : index
    %23 = vector.load %arg8[%c0_17, %c0_18] : memref<16x8xf32, #tpu.memory_space<vmem>>, vector<16x8xf32>
    tpu.vector_store %arg8[%c0_17, %c0_18], %22 {strides = array<i32>} : memref<16x8xf32, #tpu.memory_space<vmem>>, vector<16x8xf32>,
    return
  }
  func.func @transform_0(%arg0: i32) -> (i32, i32) {
    %c0_i32 = arith.constant 0 : i32
    %c0_i32_0 = arith.constant 0 : i32
    return %arg0, %c0_i32 : i32, i32
  }
  func.func @transform_1(%arg0: i32) -> (i32, i32) {
    %c0_i32 = arith.constant 0 : i32
    %c0_i32_0 = arith.constant 0 : i32
    %c0_i32_1 = arith.constant 0 : i32
    return %c0_i32, %c0_i32_0 : i32, i32
  }
  func.func @transform_2(%arg0: i32) -> (i32, i32) {
    %c0_i32 = arith.constant 0 : i32
    %c0_i32_0 = arith.constant 0 : i32
    %c0_i32_1 = arith.constant 0 : i32
    return %c0_i32, %c0_i32_0 : i32, i32
  }
  func.func @transform_3(%arg0: i32) -> (i32, i32) {
    %c0_i32 = arith.constant 0 : i32
    %c0_i32_0 = arith.constant 0 : i32
    %c0_i32_1 = arith.constant 0 : i32
    return %c0_i32, %c0_i32_0 : i32, i32
  }
  func.func @transform_4(%arg0: i32) -> (i32, i32) {
    %c0_i32 = arith.constant 0 : i32
    %c0_i32_0 = arith.constant 0 : i32
    %c0_i32_1 = arith.constant 0 : i32
    return %c0_i32, %c0_i32_0 : i32, i32
  }
  func.func @transform_5(%arg0: i32) -> (i32, i32) {
    %c0_i32 = arith.constant 0 : i32
    %c0_i32_0 = arith.constant 0 : i32
    %c0_i32_1 = arith.constant 0 : i32
    return %c0_i32, %c0_i32_0 : i32, i32
  }
  func.func @transform_6(%arg0: i32) -> (i32, i32) {
    %c0_i32 = arith.constant 0 : i32
    %c0_i32_0 = arith.constant 0 : i32
    %c0_i32_1 = arith.constant 0 : i32
    return %c0_i32, %c0_i32_0 : i32, i32
  }
  func.func @transform_7(%arg0: i32) -> (i32, i32) {
    %c0_i32 = arith.constant 0 : i32
    %c0_i32_0 = arith.constant 0 : i32
    return %arg0, %c0_i32 : i32, i32
  }
}

</mosaic_0001>

<bundles_post_ra>
// kernel: tpu_custom_call.1
= control target key start
LH: loop header
LB: loop body
LE: loop exit
PB: predicated region body
PF: predicated region fallthrough
CT: control target
= control target key end

     0   :  { %12 = vsyncpa [#allocation3], 0  ;;  %s480_s0 = inlined_call_operand.vmem [shape: f32[16,32], index: 0, kind: input, shape index: {}]   ;;  %s481_s1 = inlined_call_operand.hbm [shape: bf16[32,32], index: 1, kind: input, shape index: {}]   ;;  %s482_s2 = inlined_call_operand.vmem [shape: f32[1,32], index: 2, kind: input, shape index: {}]   ;;  %s483_s3 = inlined_call_operand.hbm [shape: bf16[32,32], index: 3, kind: input, shape index: {}]   ;;  %s484_s4 = inlined_call_operand.vmem [shape: f32[1,32], index: 4, kind: input, shape index: {}]   ;;  %s485_s5 = inlined_call_operand.vmem [shape: bf16[32,8], index: 5, kind: input, shape index: {}]   ;;  %s486_s6 = inlined_call_operand.vmem [shape: f32[1,8], index: 6, kind: input, shape index: {}]   ;;  %s487_s7 = inlined_call_operand.vmem [shape: f32[16,8], index: 7, kind: output, shape index: {}]  }
   0x1   :  { %13 = vsyncpa [#allocation5], 0  ;;  %s380_s24 = smov [#allocation2]   ;;  %s332_s28 = scalar_lea.hbm %s481_s1, 256 }
   0x2   :  { %s21_s25 = sshll.u32 %s380_s24, 4  ;;  %p333_p0 = scmp.ne.s32.totalorder %s481_s1, %s332_s28  ;;  %s22_s25 = int_to_ptr.vmem [resolvable:$true] %s21_s25 }
   0x3   :  { %p336_p1 = scmp.lt.u32.totalorder %s332_s28, %s481_s1 }
   0x5   :  { %p338_p2 = pnand %p336_p1, %p333_p0 }
   0x7   :  { %341 = shalt.err (!%p338_p2)
}
   0x8   :  { %s342_s10 = scalar_lea.vmem %s22_s25, 256  ;;  %p347_p4 = scmp.lt.s32.totalorder %s22_s25, %s22_s25 }
   0x9   :  { %p343_p3 = scmp.ne.s32.totalorder %s22_s25, %s342_s10  ;;  %p348_p5 = scmp.lt.s32.totalorder %s342_s10, %s342_s10 }
   0xb   :  { %p349_p6 = por %p348_p5, %p347_p4 }
   0xd   :  { %p350_p7 = pnand %p349_p6, %p343_p3 }
   0xf   :  { %353 = shalt.err (!%p350_p7)
}
  0x10   :  { %s381_s11 = smov 64   ;;  %s382_s12 = smov 4  }
  0x11   :  { %27 = dma.hbm_to_vmem [thread:$0]  %s481_s1, 256, %s22_s25, [#allocation3], %s381_s11, %s381_s11, %s382_s12  }
  0x12   :  { %s383_s15 = smov [#allocation4]   ;;  %s354_s19 = scalar_lea.hbm %s483_s3, 256 }
  0x13   :  { %s35_s16 = sshll.u32 %s383_s15, 4  ;;  %p355_p8 = scmp.ne.s32.totalorder %s483_s3, %s354_s19  ;;  %s36_s16 = int_to_ptr.vmem [resolvable:$true] %s35_s16 }
  0x14   :  { %p358_p9 = scmp.lt.u32.totalorder %s354_s19, %s483_s3 }
  0x16   :  { %p360_p10 = pnand %p358_p9, %p355_p8 }
  0x18   :  { %363 = shalt.err (!%p360_p10)
}
  0x19   :  { %s364_s24 = scalar_lea.vmem %s36_s16, 256  ;;  %p369_p12 = scmp.lt.s32.totalorder %s36_s16, %s36_s16 }
  0x1a   :  { %p365_p11 = scmp.ne.s32.totalorder %s36_s16, %s364_s24  ;;  %p370_p13 = scmp.lt.s32.totalorder %s364_s24, %s364_s24 }
  0x1c   :  { %p371_p0 = por %p370_p13, %p369_p12 }
  0x1e   :  { %p372_p1 = pnand %p371_p0, %p365_p11 }
  0x20   :  { %375 = shalt.err (!%p372_p1)
}
  0x21   :  { %41 = dma.hbm_to_vmem [thread:$0]  %s483_s3, 256, %s36_s16, [#allocation5], %s381_s11, %s381_s11, %s382_s12  }
  0x22   :  { %376 = dma.done.wait [#allocation3], 256  }
  0x23   :  { %377 = vsyncadd [#allocation3], 4294967040 }
  0x24   :  { %378 = dma.done.wait [#allocation5], 256  }
  0x25   :  { %379 = vsyncadd [#allocation5], 4294967040  ;;  %v384_v0 = vmov 0.0   ;;  %vm385_vm0 = vmmov 0   ;;  %v326_v1 = vld [vmem:[#allocation2] sm:$0xff]   ;;  %v327_v2 = vld [vmem:[#allocation2 + $0x8] sm:$0xff]  }
  0x26   :  { %296 = vmatprep.subr.bf16.mxu0 %v384_v0  ;;  %300 = vmatprep.mubr.msk.bf16.mxu0 %vm385_vm0, %v384_v0  ;;  %v55_v3 = vld [vmem:[%s480_s0] sm:$0xff]  ;;  %v56_v4 = vld [vmem:[%s480_s0 + $0x8] sm:$0xff]  ;;  %vm81_vm1 = vcmask 261120   ;;  %v328_v6 = vld [vmem:[#allocation4] sm:$0xff]   ;;  %vm266_vm2 = vcmask 64512  }
  0x27   :  { %304 = vmatprep.subr.bf16.mxu1 %v384_v0  ;;  %308 = vmatprep.mubr.msk.bf16.mxu1 %vm385_vm0, %v384_v0  ;;  %v57_v5 = vpack.c.bf16 %v56_v4, %v55_v3  ;;  %v329_v7 = vld [vmem:[#allocation4 + $0x8] sm:$0xff]   ;;  %v275_v8 = vld [vmem:[%s482_s2] ss:$0 sm:$0xff]  ;;  %v331_v19 = vld [vmem:[%s485_s5 + $0x8] sm:$0xff]  }
  0x28   :  { %297 = vmatpush3.bf16.msra.mxu0 %v326_v1  ;;  %305 = vmatpush3.bf16.msra.mxu1 %v328_v6  ;;  %v330_v18 = vld [vmem:[%s485_s5] sm:$0xff]  }
  0x29   :  { %298 = vmatprep.subr.bf16.mxu0 %v384_v0  ;;  %306 = vmatprep.subr.bf16.mxu1 %v384_v0  ;;  %v279_v20 = vld [vmem:[%s484_s4] ss:$0 sm:$0xff] }
  0x2a   :  { %v283_v30 = vld [vmem:[%s486_s6] ss:$0 sm:$0xff] }
  0x2c   :  { %299 = vmatpush3.bf16.msra.mxu0 %v327_v2  ;;  %307 = vmatpush3.bf16.msra.mxu1 %v329_v7 }
  0x2d   :  { %312 = vmatprep.subr.bf16.mxu0 %v384_v0 }
  0x2f   :  { %301 = vmatmul.mubr.msk.bf16.vlgmr.msra.gmra.mrb[0].mxu0 %vm81_vm1, %v57_v5 }
  0x30   :  { %316 = vmatprep.mubr.msk.bf16.mxu0 %vm385_vm0, %v384_v0  ;;  %313 = vmatpush3.bf16.msra.mxu0 %v330_v18 }
  0x31   :  { %314 = vmatprep.subr.bf16.mxu0 %v384_v0 }
  0x34   :  { %315 = vmatpush3.bf16.msra.mxu0 %v331_v19 }
 0x102   :  { %v119_v9 = vpop.f32.mrb[0].mxu0 }
 0x103   :  { %v120_v10 = vadd.f32 %v275_v8, %v119_v9  ;;  %v302_v11 = vpop.f32.mrb[1].mxu0 }
 0x104   :  { %v122_v12 = vpop.f32.mrb[2].mxu0 }
 0x105   :  { %v123_v13 = vadd.f32 %v275_v8, %v122_v12  ;;  %v303_v14 = vpop.f32.mrb[3].mxu0  ;;  %v126_v15 = vmax.f32 %v120_v10, 0.0 }
 0x107   :  { %v127_v16 = vmax.f32 %v123_v13, 0.0 }
 0x109   :  { %v128_v17 = vpack.c.bf16 %v127_v16, %v126_v15 }
 0x10b   :  { %309 = vmatmul.mubr.msk.bf16.vlgmr.msra.gmra.mrb[0].mxu1 %vm81_vm1, %v128_v17 }
 0x1de   :  { %v189_v21 = vpop.f32.mrb[0].mxu1 }
 0x1df   :  { %v190_v22 = vadd.f32 %v279_v20, %v189_v21  ;;  %v310_v23 = vpop.f32.mrb[1].mxu1 }
 0x1e0   :  { %v192_v24 = vpop.f32.mrb[2].mxu1 }
 0x1e1   :  { %v193_v25 = vadd.f32 %v279_v20, %v192_v24  ;;  %v311_v26 = vpop.f32.mrb[3].mxu1  ;;  %v196_v27 = vmax.f32 %v190_v22, 0.0 }
 0x1e3   :  { %v197_v28 = vmax.f32 %v193_v25, 0.0 }
 0x1e5   :  { %v198_v29 = vpack.c.bf16 %v197_v28, %v196_v27 }
 0x1e7   :  { %317 = vmatmul.mubr.msk.bf16.vlgmr.msra.gmra.mrb[4].mxu0 %vm81_vm1, %v198_v29 }
 0x2ba   :  { %v259_v31 = vpop.f32.mrb[4].mxu0 }
 0x2bb   :  { %v260_v32 = vadd.f32 %v283_v30, %v259_v31  ;;  %v318_v33 = vpop.f32.mrb[5].mxu0 }
 0x2bc   :  { %v262_v34 = vpop.f32.mrb[6].mxu0 }
 0x2bd   :  { %267 = vst.msk [vmem:[%s487_s7] sm:$0xff] %vm266_vm2, %v260_v32  ;;  %v263_v35 = vadd.f32 %v283_v30, %v262_v34  ;;  %v319_v36 = vpop.f32.mrb[7].mxu0 }
 0x2bf   :  { %268 = vst.msk [vmem:[%s487_s7 + $0x8] sm:$0xff] %vm266_vm2, %v263_v35 }
 0x2c0   :  { %273 = vsyncpa [#allocation3], 1 }
 0x2c1   :  { %274 = vsyncpa [#allocation5], 1 }

// kernel: tpu_custom_call.1
= control target key start
LH: loop header
LB: loop body
LE: loop exit
PB: predicated region body
PF: predicated region fallthrough
CT: control target
= control target key end

     0   :  { %12 = vsyncpa [#allocation3], 0  ;;  %s480_s0 = inlined_call_operand.vmem [shape: f32[16,32], index: 0, kind: input, shape index: {}]   ;;  %s481_s1 = inlined_call_operand.hbm [shape: bf16[32,32], index: 1, kind: input, shape index: {}]   ;;  %s482_s2 = inlined_call_operand.vmem [shape: f32[1,32], index: 2, kind: input, shape index: {}]   ;;  %s483_s3 = inlined_call_operand.hbm [shape: bf16[32,32], index: 3, kind: input, shape index: {}]   ;;  %s484_s4 = inlined_call_operand.vmem [shape: f32[1,32], index: 4, kind: input, shape index: {}]   ;;  %s485_s5 = inlined_call_operand.vmem [shape: bf16[32,8], index: 5, kind: input, shape index: {}]   ;;  %s486_s6 = inlined_call_operand.vmem [shape: f32[1,8], index: 6, kind: input, shape index: {}]   ;;  %s487_s7 = inlined_call_operand.vmem [shape: f32[16,8], index: 7, kind: output, shape index: {}]  }
   0x1   :  { %13 = vsyncpa [#allocation5], 0  ;;  %s380_s24 = smov [#allocation2]   ;;  %s332_s28 = scalar_lea.hbm %s481_s1, 256 }
   0x2   :  { %s21_s25 = sshll.u32 %s380_s24, 4  ;;  %p333_p0 = scmp.ne.s32.totalorder %s481_s1, %s332_s28  ;;  %s22_s25 = int_to_ptr.vmem [resolvable:$true] %s21_s25 }
   0x3   :  { %p336_p1 = scmp.lt.u32.totalorder %s332_s28, %s481_s1 }
   0x5   :  { %p338_p2 = pnand %p336_p1, %p333_p0 }
   0x7   :  { %341 = shalt.err (!%p338_p2)
}
   0x8   :  { %s342_s10 = scalar_lea.vmem %s22_s25, 256  ;;  %p347_p4 = scmp.lt.s32.totalorder %s22_s25, %s22_s25 }
   0x9   :  { %p343_p3 = scmp.ne.s32.totalorder %s22_s25, %s342_s10  ;;  %p348_p5 = scmp.lt.s32.totalorder %s342_s10, %s342_s10 }
   0xb   :  { %p349_p6 = por %p348_p5, %p347_p4 }
   0xd   :  { %p350_p7 = pnand %p349_p6, %p343_p3 }
   0xf   :  { %353 = shalt.err (!%p350_p7)
}
  0x10   :  { %s381_s11 = smov 64   ;;  %s382_s12 = smov 4  }
  0x11   :  { %27 = dma.hbm_to_vmem [thread:$0]  %s481_s1, 256, %s22_s25, [#allocation3], %s381_s11, %s381_s11, %s382_s12  }
  0x12   :  { %s383_s15 = smov [#allocation4]   ;;  %s354_s19 = scalar_lea.hbm %s483_s3, 256 }
  0x13   :  { %s35_s16 = sshll.u32 %s383_s15, 4  ;;  %p355_p8 = scmp.ne.s32.totalorder %s483_s3, %s354_s19  ;;  %s36_s16 = int_to_ptr.vmem [resolvable:$true] %s35_s16 }
  0x14   :  { %p358_p9 = scmp.lt.u32.totalorder %s354_s19, %s483_s3 }
  0x16   :  { %p360_p10 = pnand %p358_p9, %p355_p8 }
  0x18   :  { %363 = shalt.err (!%p360_p10)
}
  0x19   :  { %s364_s24 = scalar_lea.vmem %s36_s16, 256  ;;  %p369_p12 = scmp.lt.s32.totalorder %s36_s16, %s36_s16 }
  0x1a   :  { %p365_p11 = scmp.ne.s32.totalorder %s36_s16, %s364_s24  ;;  %p370_p13 = scmp.lt.s32.totalorder %s364_s24, %s364_s24 }
  0x1c   :  { %p371_p0 = por %p370_p13, %p369_p12 }
  0x1e   :  { %p372_p1 = pnand %p371_p0, %p365_p11 }
  0x20   :  { %375 = shalt.err (!%p372_p1)
}
  0x21   :  { %41 = dma.hbm_to_vmem [thread:$0]  %s483_s3, 256, %s36_s16, [#allocation5], %s381_s11, %s381_s11, %s382_s12  }
  0x22   :  { %376 = dma.done.wait [#allocation3], 256  }
  0x23   :  { %377 = vsyncadd [#allocation3], 4294967040 }
  0x24   :  { %378 = dma.done.wait [#allocation5], 256  }
  0x25   :  { %379 = vsyncadd [#allocation5], 4294967040  ;;  %v384_v0 = vmov 0.0   ;;  %vm385_vm0 = vmmov 0   ;;  %v326_v1 = vld [vmem:[#allocation2] sm:$0xff]   ;;  %v327_v2 = vld [vmem:[#allocation2 + $0x8] sm:$0xff]  }
  0x26   :  { %296 = vmatprep.subr.bf16.mxu0 %v384_v0  ;;  %300 = vmatprep.mubr.msk.bf16.mxu0 %vm385_vm0, %v384_v0  ;;  %v55_v3 = vld [vmem:[%s480_s0] sm:$0xff]  ;;  %v56_v4 = vld [vmem:[%s480_s0 + $0x8] sm:$0xff]  ;;  %vm81_vm1 = vcmask 261120   ;;  %v328_v6 = vld [vmem:[#allocation4] sm:$0xff]   ;;  %vm266_vm2 = vcmask 64512  }
  0x27   :  { %304 = vmatprep.subr.bf16.mxu1 %v384_v0  ;;  %308 = vmatprep.mubr.msk.bf16.mxu1 %vm385_vm0, %v384_v0  ;;  %v57_v5 = vpack.c.bf16 %v56_v4, %v55_v3  ;;  %v329_v7 = vld [vmem:[#allocation4 + $0x8] sm:$0xff]   ;;  %v275_v8 = vld [vmem:[%s482_s2] ss:$0 sm:$0xff]  ;;  %v331_v19 = vld [vmem:[%s485_s5 + $0x8] sm:$0xff]  }
  0x28   :  { %297 = vmatpush3.bf16.msra.mxu0 %v326_v1  ;;  %305 = vmatpush3.bf16.msra.mxu1 %v328_v6  ;;  %v330_v18 = vld [vmem:[%s485_s5] sm:$0xff]  }
  0x29   :  { %298 = vmatprep.subr.bf16.mxu0 %v384_v0  ;;  %306 = vmatprep.subr.bf16.mxu1 %v384_v0  ;;  %v279_v20 = vld [vmem:[%s484_s4] ss:$0 sm:$0xff] }
  0x2a   :  { %v283_v30 = vld [vmem:[%s486_s6] ss:$0 sm:$0xff] }
  0x2c   :  { %299 = vmatpush3.bf16.msra.mxu0 %v327_v2  ;;  %307 = vmatpush3.bf16.msra.mxu1 %v329_v7 }
  0x2d   :  { %312 = vmatprep.subr.bf16.mxu0 %v384_v0 }
  0x2f   :  { %301 = vmatmul.mubr.msk.bf16.vlgmr.msra.gmra.mrb[0].mxu0 %vm81_vm1, %v57_v5 }
  0x30   :  { %316 = vmatprep.mubr.msk.bf16.mxu0 %vm385_vm0, %v384_v0  ;;  %313 = vmatpush3.bf16.msra.mxu0 %v330_v18 }
  0x31   :  { %314 = vmatprep.subr.bf16.mxu0 %v384_v0 }
  0x34   :  { %315 = vmatpush3.bf16.msra.mxu0 %v331_v19 }
 0x102   :  { %v119_v9 = vpop.f32.mrb[0].mxu0 }
 0x103   :  { %v120_v10 = vadd.f32 %v275_v8, %v119_v9  ;;  %v302_v11 = vpop.f32.mrb[1].mxu0 }
 0x104   :  { %v122_v12 = vpop.f32.mrb[2].mxu0 }
 0x105   :  { %v123_v13 = vadd.f32 %v275_v8, %v122_v12  ;;  %v303_v14 = vpop.f32.mrb[3].mxu0  ;;  %v126_v15 = vmax.f32 %v120_v10, 0.0 }
 0x107   :  { %v127_v16 = vmax.f32 %v123_v13, 0.0 }
 0x109   :  { %v128_v17 = vpack.c.bf16 %v127_v16, %v126_v15 }
 0x10b   :  { %309 = vmatmul.mubr.msk.bf16.vlgmr.msra.gmra.mrb[0].mxu1 %vm81_vm1, %v128_v17 }
 0x1de   :  { %v189_v21 = vpop.f32.mrb[0].mxu1 }
 0x1df   :  { %v190_v22 = vadd.f32 %v279_v20, %v189_v21  ;;  %v310_v23 = vpop.f32.mrb[1].mxu1 }
 0x1e0   :  { %v192_v24 = vpop.f32.mrb[2].mxu1 }
 0x1e1   :  { %v193_v25 = vadd.f32 %v279_v20, %v192_v24  ;;  %v311_v26 = vpop.f32.mrb[3].mxu1  ;;  %v196_v27 = vmax.f32 %v190_v22, 0.0 }
 0x1e3   :  { %v197_v28 = vmax.f32 %v193_v25, 0.0 }
 0x1e5   :  { %v198_v29 = vpack.c.bf16 %v197_v28, %v196_v27 }
 0x1e7   :  { %317 = vmatmul.mubr.msk.bf16.vlgmr.msra.gmra.mrb[4].mxu0 %vm81_vm1, %v198_v29 }
 0x2ba   :  { %v259_v31 = vpop.f32.mrb[4].mxu0 }
 0x2bb   :  { %v260_v32 = vadd.f32 %v283_v30, %v259_v31  ;;  %v318_v33 = vpop.f32.mrb[5].mxu0 }
 0x2bc   :  { %v262_v34 = vpop.f32.mrb[6].mxu0 }
 0x2bd   :  { %267 = vst.msk [vmem:[%s487_s7] sm:$0xff] %vm266_vm2, %v260_v32  ;;  %v263_v35 = vadd.f32 %v283_v30, %v262_v34  ;;  %v319_v36 = vpop.f32.mrb[7].mxu0 }
 0x2bf   :  { %268 = vst.msk [vmem:[%s487_s7 + $0x8] sm:$0xff] %vm266_vm2, %v263_v35 }
 0x2c0   :  { %273 = vsyncpa [#allocation3], 1 }
 0x2c1   :  { %274 = vsyncpa [#allocation5], 1 }

</bundles_post_ra>
